<compile_context>
chip_gen: v7x
topology: tpu7x:2x2x1
jax: 0.10.0
libtpu: 0.0.40
codegen_flags: <defaults>
</compile_context>

<pallas_src>
import functools

import jax
import jax.numpy as jnp
from jax import lax
from jax.experimental import pallas as pl
from jax.experimental.pallas import tpu as pltpu


def _lstm_z0_kernel(w_ref, wih_ref, whh_ref, b_ref, lin_w_ref, lin_b_ref,
                    out_ref, *, seq_len: int, batch: int, hidden_size: int):
    """Whole forward in one kernel invocation (all operands fit VMEM).

    w_ref     : (S*B, F)   time-major, batch-padded, flattened weather inputs
    wih_ref   : (F, 4H)    input->gates weights
    whh_ref   : (4H, 4H)   hidden->gates weights, rows [H:4H) are zero
    b_ref     : (1, 4H)    combined bias (b_ih + b_hh)
    lin_w_ref : (1, 4H)    output linear weights, lanes [H:4H) are zero
    lin_b_ref : (1, 1)     output linear bias
    out_ref   : (B, 1)     result (padded batch)
    """
    S, B, H = seq_len, batch, hidden_size
    G = 4 * H

    # Hoisted input projection: one MXU pass for all timesteps + one bias add.
    pre = jnp.dot(w_ref[...], wih_ref[...],
                  preferred_element_type=jnp.float32) + b_ref[...]   # (S*B, 4H)

    whh = whh_ref[...]                                               # (4H, 4H)
    lane = lax.broadcasted_iota(jnp.int32, (B, G), 1)
    keep = lane < H                                                  # hoisted mask

    # h/c carries live in full-lane (B, 4H) vregs; valid data in lanes [0, H).
    h = jnp.zeros((B, G), jnp.float32)
    c = jnp.zeros((B, G), jnp.float32)

    # Statically unrolled recurrence (S is a compile-time constant).
    for t in range(S):
        gates = pre[t * B:(t + 1) * B, :] + jnp.dot(
            h, whh, preferred_element_type=jnp.float32)   # (B, 4H) = [i|f|g|o]
        sig = jax.nn.sigmoid(gates)                        # i, f, o blocks valid
        tnh = jnp.tanh(gates)                              # g block valid
        # Align gate blocks with the carry's [0, H) lanes via XLU rotations.
        f_at0 = pltpu.roll(sig, 3 * H, 1)                  # f -> lanes [0, H)
        g_at0 = pltpu.roll(tnh, 2 * H, 1)                  # g -> lanes [0, H)
        o_at0 = pltpu.roll(sig, 1 * H, 1)                  # o -> lanes [0, H)
        c = f_at0 * c + sig * g_at0                        # valid in lanes [0, H)
        h = jnp.where(keep, o_at0 * jnp.tanh(c), 0.0)      # zero garbage lanes

    # output_layer: Dropout (identity at inference) -> ReLU -> Linear(H, 1)
    # Linear is a VPU multiply + lane reduce (lin_w is zero-padded past H).
    h_relu = jnp.maximum(h, 0.0)
    y = jnp.sum(h_relu * lin_w_ref[...], axis=1, keepdims=True) + lin_b_ref[...]
    out_ref[...] = y.astype(out_ref.dtype)                 # (B, 1)


def prepare_params(w_ih, w_hh, b_ih, b_hh, lin_w, lin_b):
    """One-time (per parameter set) layout preparation, outside the hot path."""
    H4 = w_ih.shape[0]
    H = H4 // 4
    wih_t = jnp.transpose(w_ih).astype(jnp.float32)                     # (F, 4H)
    whh_pad = jnp.zeros((H4, H4), jnp.float32).at[:H, :].set(
        jnp.transpose(w_hh).astype(jnp.float32))                        # (4H, 4H)
    bias = (b_ih + b_hh).reshape(1, H4).astype(jnp.float32)             # (1, 4H)
    lin_w_pad = jnp.zeros((1, H4), jnp.float32).at[:, :H].set(
        lin_w.reshape(1, H).astype(jnp.float32))                        # (1, 4H)
    lin_b_r = lin_b.reshape(1, 1).astype(jnp.float32)                   # (1, 1)
    return wih_t, whh_pad, bias, lin_w_pad, lin_b_r


def lstm_z0_initializer_forward(w_bsf, params):
    """w_bsf: (batch, seq, n_features) float32, PyTorch-style batch-first."""
    wih_t, whh_pad, bias, lin_w_pad, lin_b_r = params
    B, S, F = w_bsf.shape
    H = whh_pad.shape[0] // 4
    B_pad = ((B + 7) // 8) * 8          # pad batch to full sublane width

    # Layout plumbing in plain JAX: time-major, pad batch, flatten time*batch.
    w_tm = jnp.transpose(w_bsf, (1, 0, 2)).astype(jnp.float32)   # (S, B, F)
    w_tm = jnp.pad(w_tm, ((0, 0), (0, B_pad - B), (0, 0)))       # (S, B_pad, F)
    w2d = w_tm.reshape(S * B_pad, F)                             # (S*B_pad, F)

    vmem = pl.BlockSpec(memory_space=pltpu.MemorySpace.VMEM)
    kernel = functools.partial(_lstm_z0_kernel,
                               seq_len=S, batch=B_pad, hidden_size=H)
    out = pl.pallas_call(
        kernel,
        out_shape=jax.ShapeDtypeStruct((B_pad, 1), jnp.float32),
        in_specs=[vmem] * 6,
        out_specs=vmem,
    )(w2d, wih_t, whh_pad, bias, lin_w_pad, lin_b_r)
    return out[:B][None]                                         # (1, B, 1)


def reference_forward(w_bsf, w_ih, w_hh, b_ih, b_hh, lin_w, lin_b):
    """Pure-JAX reference matching torch.nn.LSTMCell + output layer."""
    B, S, F = w_bsf.shape
    H = w_hh.shape[1]
    h = jnp.zeros((B, H), jnp.float32)
    c = jnp.zeros((B, H), jnp.float32)
    for t in range(S):
        x_t = w_bsf[:, t, :]
        gates = x_t @ w_ih.T + h @ w_hh.T + b_ih + b_hh
        i_g = jax.nn.sigmoid(gates[:, 0 * H:1 * H])
        f_g = jax.nn.sigmoid(gates[:, 1 * H:2 * H])
        g_g = jnp.tanh(gates[:, 2 * H:3 * H])
        o_g = jax.nn.sigmoid(gates[:, 3 * H:4 * H])
        c = f_g * c + i_g * g_g
        h = o_g * jnp.tanh(c)
    y = jnp.maximum(h, 0.0) @ lin_w.T + lin_b
    return y[None]


if __name__ == "__main__":
    # Small shapes consistent with the module.
    n_weather_features = 4
    weather_embedding_size = 32   # hidden size H (> 2 -> dropout branch)
    batch = 2
    seq = 8

    key = jax.random.PRNGKey(0)
    ks = jax.random.split(key, 7)
    scale = 0.1
    w = jax.random.normal(ks[0], (batch, seq, n_weather_features), jnp.float32)
    # LSTMCell params (PyTorch shapes): (4H, F), (4H, H), (4H,), (4H,)
    H = weather_embedding_size
    w_ih = scale * jax.random.normal(ks[1], (4 * H, n_weather_features), jnp.float32)
    w_hh = scale * jax.random.normal(ks[2], (4 * H, H), jnp.float32)
    b_ih = scale * jax.random.normal(ks[3], (4 * H,), jnp.float32)
    b_hh = scale * jax.random.normal(ks[4], (4 * H,), jnp.float32)
    # Output Linear(H, 1): weight (1, H), bias (1,)
    lin_w = scale * jax.random.normal(ks[5], (1, H), jnp.float32)
    lin_b = scale * jax.random.normal(ks[6], (1,), jnp.float32)

    params = prepare_params(w_ih, w_hh, b_ih, b_hh, lin_w, lin_b)
    out = lstm_z0_initializer_forward(w, params)
    out = jax.block_until_ready(out)

    ref = reference_forward(w, w_ih, w_hh, b_ih, b_hh, lin_w, lin_b)
    assert out.shape == (1, batch, 1), out.shape
    assert jnp.allclose(out, ref, atol=1e-5, rtol=1e-5), (out, ref)

    print("KERNEL_OK")
</pallas_src>

<mosaic_0001>
module attributes {stable_mosaic.version = 11 : i64} {
  func.func @_lstm_z0_kernel(%arg0: memref<64x4xf32, #tpu.memory_space<vmem>>, %arg1: memref<4x128xf32, #tpu.memory_space<vmem>>, %arg2: memref<128x128xf32, #tpu.memory_space<vmem>>, %arg3: memref<1x128xf32, #tpu.memory_space<vmem>>, %arg4: memref<1x128xf32, #tpu.memory_space<vmem>>, %arg5: memref<1x1xf32, #tpu.memory_space<vmem>>, %arg6: memref<8x1xf32, #tpu.memory_space<vmem>>) attributes {dimension_semantics = [], scalar_prefetch = 0 : i64, scratch_operands = 0 : i64, tpu.core_type = #tpu.core_type<tc>} {
    %c0 = arith.constant 0 : index
    %c0_0 = arith.constant 0 : index
    %0 = vector.load %arg0[%c0, %c0_0] : memref<64x4xf32, #tpu.memory_space<vmem>>, vector<64x4xf32>
    %c0_1 = arith.constant 0 : index
    %c0_2 = arith.constant 0 : index
    %1 = vector.load %arg1[%c0_1, %c0_2] : memref<4x128xf32, #tpu.memory_space<vmem>>, vector<4x128xf32>
    %cst = arith.constant dense<0.000000e+00> : vector<64x128xf32>
    %2 = tpu.matmul %0, %1, %cst {dimension_numbers = #tpu.dot_dimension_numbers<[1], [0], [0], [1], [0, 0, 1, 1], [], []>} : vector<64x4xf32>, vector<4x128xf32>, vector<64x128xf32> -> vector<64x128xf32>
    %c0_3 = arith.constant 0 : index
    %c0_4 = arith.constant 0 : index
    %3 = vector.load %arg3[%c0_3, %c0_4] : memref<1x128xf32, #tpu.memory_space<vmem>>, vector<1x128xf32>
    %4 = vector.broadcast %3 : vector<1x128xf32> to vector<64x128xf32>
    %5 = arith.addf %2, %4 : vector<64x128xf32>
    %c0_5 = arith.constant 0 : index
    %c0_6 = arith.constant 0 : index
    %6 = vector.load %arg2[%c0_5, %c0_6] : memref<128x128xf32, #tpu.memory_space<vmem>>, vector<128x128xf32>
    %7 = tpu.iota {dimensions = array<i32: 1>} : vector<8x128xi32>
    %c32_i32 = arith.constant 32 : i32
    %8 = vector.broadcast %c32_i32 : i32 to vector<8x128xi32>
    %9 = arith.cmpi slt, %7, %8 : vector<8x128xi32>
    %cst_7 = arith.constant 0.000000e+00 : f32
    %10 = vector.broadcast %cst_7 : f32 to vector<8x128xf32>
    %cst_8 = arith.constant 0.000000e+00 : f32
    %11 = vector.broadcast %cst_8 : f32 to vector<8x128xf32>
    %12 = vector.extract_strided_slice %5 {offsets = [0, 0], sizes = [8, 128], strides = [1, 1]} : vector<64x128xf32> to vector<8x128xf32>
    %cst_9 = arith.constant dense<0.000000e+00> : vector<8x128xf32>
    %13 = tpu.matmul %10, %6, %cst_9 {dimension_numbers = #tpu.dot_dimension_numbers<[1], [0], [0], [1], [0, 0, 1, 1], [], []>} : vector<8x128xf32>, vector<128x128xf32>, vector<8x128xf32> -> vector<8x128xf32>
    %14 = arith.addf %12, %13 : vector<8x128xf32>
    %15 = arith.negf %14 : vector<8x128xf32>
    %16 = math.exp %15 : vector<8x128xf32>
    %cst_10 = arith.constant 1.000000e+00 : f32
    %17 = vector.broadcast %cst_10 : f32 to vector<8x128xf32>
    %18 = arith.addf %17, %16 : vector<8x128xf32>
    %19 = arith.divf %17, %18 : vector<8x128xf32>
    %20 = math.tanh %14 : vector<8x128xf32>
    %c96_i32 = arith.constant 96 : i32
    %21 = tpu.dynamic_rotate %19 by %c96_i32 dim 1 : vector<8x128xf32>, i32 -> vector<8x128xf32>
    %c64_i32 = arith.constant 64 : i32
    %22 = tpu.dynamic_rotate %20 by %c64_i32 dim 1 : vector<8x128xf32>, i32 -> vector<8x128xf32>
    %c32_i32_11 = arith.constant 32 : i32
    %23 = tpu.dynamic_rotate %19 by %c32_i32_11 dim 1 : vector<8x128xf32>, i32 -> vector<8x128xf32>
    %24 = arith.mulf %21, %11 : vector<8x128xf32>
    %25 = arith.mulf %19, %22 : vector<8x128xf32>
    %26 = arith.addf %24, %25 : vector<8x128xf32>
    %27 = math.tanh %26 : vector<8x128xf32>
    %28 = arith.mulf %23, %27 : vector<8x128xf32>
    %cst_12 = arith.constant 0.000000e+00 : f32
    %29 = vector.broadcast %cst_12 : f32 to vector<8x128xf32>
    %30 = arith.select %9, %28, %29 : vector<8x128xi1>, vector<8x128xf32>
    %31 = vector.extract_strided_slice %5 {offsets = [8, 0], sizes = [8, 128], strides = [1, 1]} : vector<64x128xf32> to vector<8x128xf32>
    %cst_13 = arith.constant dense<0.000000e+00> : vector<8x128xf32>
    %32 = tpu.matmul %30, %6, %cst_13 {dimension_numbers = #tpu.dot_dimension_numbers<[1], [0], [0], [1], [0, 0, 1, 1], [], []>} : vector<8x128xf32>, vector<128x128xf32>, vector<8x128xf32> -> vector<8x128xf32>
    %33 = arith.addf %31, %32 : vector<8x128xf32>
    %34 = arith.negf %33 : vector<8x128xf32>
    %35 = math.exp %34 : vector<8x128xf32>
    %cst_14 = arith.constant 1.000000e+00 : f32
    %36 = vector.broadcast %cst_14 : f32 to vector<8x128xf32>
    %37 = arith.addf %36, %35 : vector<8x128xf32>
    %38 = arith.divf %36, %37 : vector<8x128xf32>
    %39 = math.tanh %33 : vector<8x128xf32>
    %c96_i32_15 = arith.constant 96 : i32
    %40 = tpu.dynamic_rotate %38 by %c96_i32_15 dim 1 : vector<8x128xf32>, i32 -> vector<8x128xf32>
    %c64_i32_16 = arith.constant 64 : i32
    %41 = tpu.dynamic_rotate %39 by %c64_i32_16 dim 1 : vector<8x128xf32>, i32 -> vector<8x128xf32>
    %c32_i32_17 = arith.constant 32 : i32
    %42 = tpu.dynamic_rotate %38 by %c32_i32_17 dim 1 : vector<8x128xf32>, i32 -> vector<8x128xf32>
    %43 = arith.mulf %40, %26 : vector<8x128xf32>
    %44 = arith.mulf %38, %41 : vector<8x128xf32>
    %45 = arith.addf %43, %44 : vector<8x128xf32>
    %46 = math.tanh %45 : vector<8x128xf32>
    %47 = arith.mulf %42, %46 : vector<8x128xf32>
    %cst_18 = arith.constant 0.000000e+00 : f32
    %48 = vector.broadcast %cst_18 : f32 to vector<8x128xf32>
    %49 = arith.select %9, %47, %48 : vector<8x128xi1>, vector<8x128xf32>
    %50 = vector.extract_strided_slice %5 {offsets = [16, 0], sizes = [8, 128], strides = [1, 1]} : vector<64x128xf32> to vector<8x128xf32>
    %cst_19 = arith.constant dense<0.000000e+00> : vector<8x128xf32>
    %51 = tpu.matmul %49, %6, %cst_19 {dimension_numbers = #tpu.dot_dimension_numbers<[1], [0], [0], [1], [0, 0, 1, 1], [], []>} : vector<8x128xf32>, vector<128x128xf32>, vector<8x128xf32> -> vector<8x128xf32>
    %52 = arith.addf %50, %51 : vector<8x128xf32>
    %53 = arith.negf %52 : vector<8x128xf32>
    %54 = math.exp %53 : vector<8x128xf32>
    %cst_20 = arith.constant 1.000000e+00 : f32
    %55 = vector.broadcast %cst_20 : f32 to vector<8x128xf32>
    %56 = arith.addf %55, %54 : vector<8x128xf32>
    %57 = arith.divf %55, %56 : vector<8x128xf32>
    %58 = math.tanh %52 : vector<8x128xf32>
    %c96_i32_21 = arith.constant 96 : i32
    %59 = tpu.dynamic_rotate %57 by %c96_i32_21 dim 1 : vector<8x128xf32>, i32 -> vector<8x128xf32>
    %c64_i32_22 = arith.constant 64 : i32
    %60 = tpu.dynamic_rotate %58 by %c64_i32_22 dim 1 : vector<8x128xf32>, i32 -> vector<8x128xf32>
    %c32_i32_23 = arith.constant 32 : i32
    %61 = tpu.dynamic_rotate %57 by %c32_i32_23 dim 1 : vector<8x128xf32>, i32 -> vector<8x128xf32>
    %62 = arith.mulf %59, %45 : vector<8x128xf32>
    %63 = arith.mulf %57, %60 : vector<8x128xf32>
    %64 = arith.addf %62, %63 : vector<8x128xf32>
    %65 = math.tanh %64 : vector<8x128xf32>
    %66 = arith.mulf %61, %65 : vector<8x128xf32>
    %cst_24 = arith.constant 0.000000e+00 : f32
    %67 = vector.broadcast %cst_24 : f32 to vector<8x128xf32>
    %68 = arith.select %9, %66, %67 : vector<8x128xi1>, vector<8x128xf32>
    %69 = vector.extract_strided_slice %5 {offsets = [24, 0], sizes = [8, 128], strides = [1, 1]} : vector<64x128xf32> to vector<8x128xf32>
    %cst_25 = arith.constant dense<0.000000e+00> : vector<8x128xf32>
    %70 = tpu.matmul %68, %6, %cst_25 {dimension_numbers = #tpu.dot_dimension_numbers<[1], [0], [0], [1], [0, 0, 1, 1], [], []>} : vector<8x128xf32>, vector<128x128xf32>, vector<8x128xf32> -> vector<8x128xf32>
    %71 = arith.addf %69, %70 : vector<8x128xf32>
    %72 = arith.negf %71 : vector<8x128xf32>
    %73 = math.exp %72 : vector<8x128xf32>
    %cst_26 = arith.constant 1.000000e+00 : f32
    %74 = vector.broadcast %cst_26 : f32 to vector<8x128xf32>
    %75 = arith.addf %74, %73 : vector<8x128xf32>
    %76 = arith.divf %74, %75 : vector<8x128xf32>
    %77 = math.tanh %71 : vector<8x128xf32>
    %c96_i32_27 = arith.constant 96 : i32
    %78 = tpu.dynamic_rotate %76 by %c96_i32_27 dim 1 : vector<8x128xf32>, i32 -> vector<8x128xf32>
    %c64_i32_28 = arith.constant 64 : i32
    %79 = tpu.dynamic_rotate %77 by %c64_i32_28 dim 1 : vector<8x128xf32>, i32 -> vector<8x128xf32>
    %c32_i32_29 = arith.constant 32 : i32
    %80 = tpu.dynamic_rotate %76 by %c32_i32_29 dim 1 : vector<8x128xf32>, i32 -> vector<8x128xf32>
    %81 = arith.mulf %78, %64 : vector<8x128xf32>
    %82 = arith.mulf %76, %79 : vector<8x128xf32>
    %83 = arith.addf %81, %82 : vector<8x128xf32>
    %84 = math.tanh %83 : vector<8x128xf32>
    %85 = arith.mulf %80, %84 : vector<8x128xf32>
    %cst_30 = arith.constant 0.000000e+00 : f32
    %86 = vector.broadcast %cst_30 : f32 to vector<8x128xf32>
    %87 = arith.select %9, %85, %86 : vector<8x128xi1>, vector<8x128xf32>
    %88 = vector.extract_strided_slice %5 {offsets = [32, 0], sizes = [8, 128], strides = [1, 1]} : vector<64x128xf32> to vector<8x128xf32>
    %cst_31 = arith.constant dense<0.000000e+00> : vector<8x128xf32>
    %89 = tpu.matmul %87, %6, %cst_31 {dimension_numbers = #tpu.dot_dimension_numbers<[1], [0], [0], [1], [0, 0, 1, 1], [], []>} : vector<8x128xf32>, vector<128x128xf32>, vector<8x128xf32> -> vector<8x128xf32>
    %90 = arith.addf %88, %89 : vector<8x128xf32>
    %91 = arith.negf %90 : vector<8x128xf32>
    %92 = math.exp %91 : vector<8x128xf32>
    %cst_32 = arith.constant 1.000000e+00 : f32
    %93 = vector.broadcast %cst_32 : f32 to vector<8x128xf32>
    %94 = arith.addf %93, %92 : vector<8x128xf32>
    %95 = arith.divf %93, %94 : vector<8x128xf32>
    %96 = math.tanh %90 : vector<8x128xf32>
    %c96_i32_33 = arith.constant 96 : i32
    %97 = tpu.dynamic_rotate %95 by %c96_i32_33 dim 1 : vector<8x128xf32>, i32 -> vector<8x128xf32>
    %c64_i32_34 = arith.constant 64 : i32
    %98 = tpu.dynamic_rotate %96 by %c64_i32_34 dim 1 : vector<8x128xf32>, i32 -> vector<8x128xf32>
    %c32_i32_35 = arith.constant 32 : i32
    %99 = tpu.dynamic_rotate %95 by %c32_i32_35 dim 1 : vector<8x128xf32>, i32 -> vector<8x128xf32>
    %100 = arith.mulf %97, %83 : vector<8x128xf32>
    %101 = arith.mulf %95, %98 : vector<8x128xf32>
    %102 = arith.addf %100, %101 : vector<8x128xf32>
    %103 = math.tanh %102 : vector<8x128xf32>
    %104 = arith.mulf %99, %103 : vector<8x128xf32>
    %cst_36 = arith.constant 0.000000e+00 : f32
    %105 = vector.broadcast %cst_36 : f32 to vector<8x128xf32>
    %106 = arith.select %9, %104, %105 : vector<8x128xi1>, vector<8x128xf32>
    %107 = vector.extract_strided_slice %5 {offsets = [40, 0], sizes = [8, 128], strides = [1, 1]} : vector<64x128xf32> to vector<8x128xf32>
    %cst_37 = arith.constant dense<0.000000e+00> : vector<8x128xf32>
    %108 = tpu.matmul %106, %6, %cst_37 {dimension_numbers = #tpu.dot_dimension_numbers<[1], [0], [0], [1], [0, 0, 1, 1], [], []>} : vector<8x128xf32>, vector<128x128xf32>, vector<8x128xf32> -> vector<8x128xf32>
    %109 = arith.addf %107, %108 : vector<8x128xf32>
    %110 = arith.negf %109 : vector<8x128xf32>
    %111 = math.exp %110 : vector<8x128xf32>
    %cst_38 = arith.constant 1.000000e+00 : f32
    %112 = vector.broadcast %cst_38 : f32 to vector<8x128xf32>
    %113 = arith.addf %112, %111 : vector<8x128xf32>
    %114 = arith.divf %112, %113 : vector<8x128xf32>
    %115 = math.tanh %109 : vector<8x128xf32>
    %c96_i32_39 = arith.constant 96 : i32
    %116 = tpu.dynamic_rotate %114 by %c96_i32_39 dim 1 : vector<8x128xf32>, i32 -> vector<8x128xf32>
    %c64_i32_40 = arith.constant 64 : i32
    %117 = tpu.dynamic_rotate %115 by %c64_i32_40 dim 1 : vector<8x128xf32>, i32 -> vector<8x128xf32>
    %c32_i32_41 = arith.constant 32 : i32
    %118 = tpu.dynamic_rotate %114 by %c32_i32_41 dim 1 : vector<8x128xf32>, i32 -> vector<8x128xf32>
    %119 = arith.mulf %116, %102 : vector<8x128xf32>
    %120 = arith.mulf %114, %117 : vector<8x128xf32>
    %121 = arith.addf %119, %120 : vector<8x128xf32>
    %122 = math.tanh %121 : vector<8x128xf32>
    %123 = arith.mulf %118, %122 : vector<8x128xf32>
    %cst_42 = arith.constant 0.000000e+00 : f32
    %124 = vector.broadcast %cst_42 : f32 to vector<8x128xf32>
    %125 = arith.select %9, %123, %124 : vector<8x128xi1>, vector<8x128xf32>
    %126 = vector.extract_strided_slice %5 {offsets = [48, 0], sizes = [8, 128], strides = [1, 1]} : vector<64x128xf32> to vector<8x128xf32>
    %cst_43 = arith.constant dense<0.000000e+00> : vector<8x128xf32>
    %127 = tpu.matmul %125, %6, %cst_43 {dimension_numbers = #tpu.dot_dimension_numbers<[1], [0], [0], [1], [0, 0, 1, 1], [], []>} : vector<8x128xf32>, vector<128x128xf32>, vector<8x128xf32> -> vector<8x128xf32>
    %128 = arith.addf %126, %127 : vector<8x128xf32>
    %129 = arith.negf %128 : vector<8x128xf32>
    %130 = math.exp %129 : vector<8x128xf32>
    %cst_44 = arith.constant 1.000000e+00 : f32
    %131 = vector.broadcast %cst_44 : f32 to vector<8x128xf32>
    %132 = arith.addf %131, %130 : vector<8x128xf32>
    %133 = arith.divf %131, %132 : vector<8x128xf32>
    %134 = math.tanh %128 : vector<8x128xf32>
    %c96_i32_45 = arith.constant 96 : i32
    %135 = tpu.dynamic_rotate %133 by %c96_i32_45 dim 1 : vector<8x128xf32>, i32 -> vector<8x128xf32>
    %c64_i32_46 = arith.constant 64 : i32
    %136 = tpu.dynamic_rotate %134 by %c64_i32_46 dim 1 : vector<8x128xf32>, i32 -> vector<8x128xf32>
    %c32_i32_47 = arith.constant 32 : i32
    %137 = tpu.dynamic_rotate %133 by %c32_i32_47 dim 1 : vector<8x128xf32>, i32 -> vector<8x128xf32>
    %138 = arith.mulf %135, %121 : vector<8x128xf32>
    %139 = arith.mulf %133, %136 : vector<8x128xf32>
    %140 = arith.addf %138, %139 : vector<8x128xf32>
    %141 = math.tanh %140 : vector<8x128xf32>
    %142 = arith.mulf %137, %141 : vector<8x128xf32>
    %cst_48 = arith.constant 0.000000e+00 : f32
    %143 = vector.broadcast %cst_48 : f32 to vector<8x128xf32>
    %144 = arith.select %9, %142, %143 : vector<8x128xi1>, vector<8x128xf32>
    %145 = vector.extract_strided_slice %5 {offsets = [56, 0], sizes = [8, 128], strides = [1, 1]} : vector<64x128xf32> to vector<8x128xf32>
    %cst_49 = arith.constant dense<0.000000e+00> : vector<8x128xf32>
    %146 = tpu.matmul %144, %6, %cst_49 {dimension_numbers = #tpu.dot_dimension_numbers<[1], [0], [0], [1], [0, 0, 1, 1], [], []>} : vector<8x128xf32>, vector<128x128xf32>, vector<8x128xf32> -> vector<8x128xf32>
    %147 = arith.addf %145, %146 : vector<8x128xf32>
    %148 = arith.negf %147 : vector<8x128xf32>
    %149 = math.exp %148 : vector<8x128xf32>
    %cst_50 = arith.constant 1.000000e+00 : f32
    %150 = vector.broadcast %cst_50 : f32 to vector<8x128xf32>
    %151 = arith.addf %150, %149 : vector<8x128xf32>
    %152 = arith.divf %150, %151 : vector<8x128xf32>
    %153 = math.tanh %147 : vector<8x128xf32>
    %c96_i32_51 = arith.constant 96 : i32
    %154 = tpu.dynamic_rotate %152 by %c96_i32_51 dim 1 : vector<8x128xf32>, i32 -> vector<8x128xf32>
    %c64_i32_52 = arith.constant 64 : i32
    %155 = tpu.dynamic_rotate %153 by %c64_i32_52 dim 1 : vector<8x128xf32>, i32 -> vector<8x128xf32>
    %c32_i32_53 = arith.constant 32 : i32
    %156 = tpu.dynamic_rotate %152 by %c32_i32_53 dim 1 : vector<8x128xf32>, i32 -> vector<8x128xf32>
    %157 = arith.mulf %154, %140 : vector<8x128xf32>
    %158 = arith.mulf %152, %155 : vector<8x128xf32>
    %159 = arith.addf %157, %158 : vector<8x128xf32>
    %160 = math.tanh %159 : vector<8x128xf32>
    %161 = arith.mulf %156, %160 : vector<8x128xf32>
    %cst_54 = arith.constant 0.000000e+00 : f32
    %162 = vector.broadcast %cst_54 : f32 to vector<8x128xf32>
    %163 = arith.select %9, %161, %162 : vector<8x128xi1>, vector<8x128xf32>
    %cst_55 = arith.constant 0.000000e+00 : f32
    %164 = vector.broadcast %cst_55 : f32 to vector<8x128xf32>
    %165 = arith.maximumf %163, %164 : vector<8x128xf32>
    %c0_56 = arith.constant 0 : index
    %c0_57 = arith.constant 0 : index
    %166 = vector.load %arg4[%c0_56, %c0_57] : memref<1x128xf32, #tpu.memory_space<vmem>>, vector<1x128xf32>
    %167 = vector.broadcast %166 : vector<1x128xf32> to vector<8x128xf32>
    %168 = arith.mulf %165, %167 : vector<8x128xf32>
    %cst_58 = arith.constant dense<0.000000e+00> : vector<8xf32>
    %169 = vector.multi_reduction <add>, %168, %cst_58 [1] : vector<8x128xf32> to vector<8xf32>
    %170 = vector.shape_cast %169 : vector<8xf32> to vector<8x1xf32>
    %c0_59 = arith.constant 0 : index
    %c0_60 = arith.constant 0 : index
    %171 = vector.load %arg5[%c0_59, %c0_60] : memref<1x1xf32, #tpu.memory_space<vmem>>, vector<1x1xf32>
    %172 = vector.broadcast %171 : vector<1x1xf32> to vector<8x1xf32>
    %173 = arith.addf %170, %172 : vector<8x1xf32>
    %c0_61 = arith.constant 0 : index
    %c0_62 = arith.constant 0 : index
    %174 = vector.load %arg6[%c0_61, %c0_62] : memref<8x1xf32, #tpu.memory_space<vmem>>, vector<8x1xf32>
    tpu.vector_store %arg6[%c0_61, %c0_62], %173 {strides = array<i32>} : memref<8x1xf32, #tpu.memory_space<vmem>>, vector<8x1xf32>,
    return
  }
}

</mosaic_0001>

<bundles_post_ra>
// kernel: tpu_custom_call.1
= control target key start
LH: loop header
LB: loop body
LE: loop exit
PB: predicated region body
PF: predicated region fallthrough
CT: control target
= control target key end

     0   :  { %s2044_s0 = inlined_call_operand.vmem [shape: f32[64,4], index: 0, kind: input, shape index: {}]   ;;  %s2045_s1 = inlined_call_operand.vmem [shape: f32[4,128], index: 1, kind: input, shape index: {}]   ;;  %s2046_s2 = inlined_call_operand.hbm [shape: f32[128,128], index: 2, kind: input, shape index: {}]   ;;  %s2047_s3 = inlined_call_operand.vmem [shape: f32[1,128], index: 3, kind: input, shape index: {}]   ;;  %s2048_s4 = inlined_call_operand.vmem [shape: f32[1,128], index: 4, kind: input, shape index: {}]   ;;  %s2049_s5 = inlined_call_operand.<no memory space> [shape: f32[1,1], index: 5, kind: input, shape index: {}]   ;;  %s2050_s6 = inlined_call_operand.vmem [shape: f32[8,1], index: 6, kind: output, shape index: {}]  }
   0x1   :  { %v11_v0 = vstv %s2049_s5 }
   0x2   :  { %12 = vst [vmem:[#allocation2] sm:$0x1] %v11_v0 }
   0x3   :  { %13 = vsyncpa [#allocation4], 0  ;;  %s1709_s23 = smov [#allocation3]   ;;  %s1685_s27 = scalar_lea.hbm %s2046_s2, 2048 }
   0x4   :  { %s23_s24 = sshll.u32 %s1709_s23, 4  ;;  %p1686_p0 = scmp.ne.s32.totalorder %s2046_s2, %s1685_s27  ;;  %s24_s24 = int_to_ptr.vmem [resolvable:$true] %s23_s24 }
   0x5   :  { %p1689_p1 = scmp.lt.u32.totalorder %s1685_s27, %s2046_s2 }
   0x7   :  { %p1691_p2 = pnand %p1689_p1, %p1686_p0 }
   0x9   :  { %1694 = shalt.err (!%p1691_p2)
}
   0xa   :  { %s1695_s5 = scalar_lea.vmem %s24_s24, 2048  ;;  %p1700_p4 = scmp.lt.s32.totalorder %s24_s24, %s24_s24 }
   0xb   :  { %p1696_p3 = scmp.ne.s32.totalorder %s24_s24, %s1695_s5  ;;  %p1701_p5 = scmp.lt.s32.totalorder %s1695_s5, %s1695_s5 }
   0xd   :  { %p1702_p6 = por %p1701_p5, %p1700_p4 }
   0xf   :  { %p1703_p7 = pnand %p1702_p6, %p1696_p3 }
  0x11   :  { %1706 = shalt.err (!%p1703_p7)
}
  0x12   :  { %s1710_s8 = smov 128   ;;  %s1711_s9 = smov 8  }
  0x13   :  { %29 = dma.hbm_to_vmem [thread:$0]  %s2046_s2, 2048, %s24_s24, [#allocation4], %s1710_s8, %s1710_s8, %s1711_s9  }
  0x14   :  { %1707 = dma.done.wait [#allocation4], 2048  }
  0x15   :  { %1708 = vsyncadd [#allocation4], 4294965248  ;;  %v1712_v1 = vmov 0.0|0.0   ;;  %vm1713_vm0 = vmmov 0   ;;  %v1714_v2 = vmov 0.0   ;;  %v189_v3 = vld [vmem:[#allocation3] sm:$0xff]  ;;  %v205_v53 = vlaneseq }
  0x16   :  { %1420 = vmatprep.subr.bf16.mxu1 %v1712_v1  ;;  %1172 = vmatprep.mubr.msk.f32.mxu1 %vm1713_vm0, %v1714_v2  ;;  %v190_v4 = vld [vmem:[#allocation3 + $0x8] sm:$0xff]  ;;  %v191_v5 = vld [vmem:[#allocation3 + $0x10] sm:$0xff]  ;;  %v192_v7 = vld [vmem:[#allocation3 + $0x18] sm:$0xff]  ;;  %vm80_vm1 = vcmask 1043456   ;;  %vm55_vm2 = vcmask 31744   ;;  %s1715_s25 = smov 32  }
  0x17   :  { %v1771_v6 = vpack.c.bf16 %v190_v4, %v189_v3  ;;  %v1774_v8 = vpack.c.bf16 %v192_v7, %v191_v5  ;;  %v193_v9 = vld [vmem:[#allocation3 + $0x20] sm:$0xff]  ;;  %v194_v10 = vld [vmem:[#allocation3 + $0x28] sm:$0xff]  ;;  %v195_v15 = vld [vmem:[#allocation3 + $0x30] sm:$0xff]  ;;  %s1716_s26 = smov 96   ;;  %s1717_s7 = smov 64   ;;  %v1887_v54 = vand.u32 127, %v205_v53 }
  0x18   :  { %v47_v11 = vld [vmem:[%s2045_s1] sm:$0xf]  ;;  %v40_v13 = vld [vmem:[%s2044_s0 + $0x8] sm:$0xff]  ;;  %v1788_v14 = vpack.c.bf16 %v194_v10, %v193_v9  ;;  %v199_v21 = vld [vmem:[#allocation3 + $0x50] sm:$0xff]  ;;  %vm947_vm4 = vcmask 7168  }
  0x19   :  { %1422 = vmatpush3.bf16.msra.mxu1 %v1771_v6  ;;  %1126 = vmatprep.subr.msk.mxu0 %vm80_vm1, %v47_v11  ;;  %v39_v12 = vld [vmem:[%s2044_s0] sm:$0xff]  ;;  %v198_v19 = vld [vmem:[#allocation3 + $0x48] sm:$0xff]  ;;  %v203_v27 = vld [vmem:[#allocation3 + $0x70] sm:$0xff]  ;;  %vm207_vm3 = vcmp.lt.s32.totalorder %v1887_v54, 32 }
  0x1a   :  { %1423 = vmatprep.subr.bf16.mxu1 %v1712_v1  ;;  %1127 = vmatpush3.msk.msra.mxu0 %vm80_vm1, %v47_v11  ;;  %v196_v16 = vld [vmem:[#allocation3 + $0x38] sm:$0xff]  ;;  %v197_v18 = vld [vmem:[#allocation3 + $0x40] sm:$0xff]  ;;  %v202_v25 = vld [vmem:[#allocation3 + $0x68] sm:$0xff] }
  0x1b   :  { %1128 = vmatprep.mubr.msk.f32.mxu0 %vm55_vm2, %v39_v12  ;;  %1444 = vmatprep.subr.bf16.mxu0 %v1712_v1  ;;  %v1796_v17 = vpack.c.bf16 %v196_v16, %v195_v15  ;;  %v1802_v20 = vpack.c.bf16 %v198_v19, %v197_v18  ;;  %v200_v22 = vld [vmem:[#allocation3 + $0x58] sm:$0xff]  ;;  %v201_v24 = vld [vmem:[#allocation3 + $0x60] sm:$0xff]  ;;  %v41_v40 = vld [vmem:[%s2044_s0 + $0x10] sm:$0xff] }
  0x1c   :  { %1129 = vmatmul.mubr.msk.f32.vlgmr.msra.gmra.mrb[0].mxu0 %vm55_vm2, %v40_v13  ;;  %v1808_v23 = vpack.c.bf16 %v200_v22, %v199_v21  ;;  %v1814_v26 = vpack.c.bf16 %v202_v25, %v201_v24  ;;  %v204_v28 = vld [vmem:[#allocation3 + $0x78] sm:$0xff]  ;;  %v44_v43 = vld [vmem:[%s2044_s0 + $0x28] sm:$0xff]  ;;  %v45_v45 = vld [vmem:[%s2044_s0 + $0x30] sm:$0xff] }
  0x1d   :  { %1425 = vmatpush3.bf16.msra.mxu1 %v1774_v8  ;;  %1446 = vmatpush3.bf16.msra.mxu0 %v1771_v6  ;;  %v1820_v29 = vpack.c.bf16 %v204_v28, %v203_v27  ;;  %v1855_v32 = vld [vmem:[%s2047_s3] ss:$0 sm:$0xff]  ;;  %v42_v41 = vld [vmem:[%s2044_s0 + $0x18] sm:$0xff] }
  0x1e   :  { %1426 = vmatprep.subr.bf16.mxu1 %v1712_v1  ;;  %1447 = vmatprep.subr.bf16.mxu0 %v1712_v1  ;;  %v43_v42 = vld [vmem:[%s2044_s0 + $0x20] sm:$0xff]  ;;  %v46_v46 = vld [vmem:[%s2044_s0 + $0x38] sm:$0xff] }
  0x1f   :  { %1131 = vmatprep.mubr.msk.f32.mxu0 %vm55_vm2, %v41_v40 }
  0x20   :  { %1132 = vmatmul.mubr.msk.f32.gmra.mrb[2].mxu0 %vm55_vm2, %v42_v41 }
  0x21   :  { %1428 = vmatpush3.bf16.msra.mxu1 %v1788_v14  ;;  %1449 = vmatpush3.bf16.msra.mxu0 %v1774_v8 }
  0x22   :  { %1429 = vmatprep.subr.bf16.mxu1 %v1712_v1  ;;  %1450 = vmatprep.subr.bf16.mxu0 %v1712_v1 }
  0x23   :  { %1134 = vmatprep.mubr.msk.f32.mxu0 %vm55_vm2, %v43_v42 }
  0x24   :  { %1135 = vmatmul.mubr.msk.f32.gmra.mrb[4].mxu0 %vm55_vm2, %v44_v43 }
  0x25   :  { %1431 = vmatpush3.bf16.msra.mxu1 %v1796_v17  ;;  %1452 = vmatpush3.bf16.msra.mxu0 %v1788_v14 }
  0x26   :  { %1432 = vmatprep.subr.bf16.mxu1 %v1712_v1  ;;  %1453 = vmatprep.subr.bf16.mxu0 %v1712_v1 }
  0x27   :  { %1137 = vmatprep.mubr.msk.f32.mxu0 %vm55_vm2, %v45_v45 }
  0x28   :  { %1138 = vmatmul.mubr.msk.f32.gmra.mrb[6].mxu0 %vm55_vm2, %v46_v46 }
  0x29   :  { %1434 = vmatpush3.bf16.msra.mxu1 %v1802_v20  ;;  %1455 = vmatpush3.bf16.msra.mxu0 %v1796_v17 }
  0x2a   :  { %1435 = vmatprep.subr.bf16.mxu1 %v1712_v1  ;;  %1456 = vmatprep.subr.bf16.mxu0 %v1712_v1 }
  0x2b   :  { %1207 = vmatprep.mubr.msk.f32.mxu0 %vm1713_vm0, %v1714_v2 }
  0x2d   :  { %1437 = vmatpush3.bf16.msra.mxu1 %v1808_v23  ;;  %1458 = vmatpush3.bf16.msra.mxu0 %v1802_v20 }
  0x2e   :  { %1438 = vmatprep.subr.bf16.mxu1 %v1712_v1  ;;  %1459 = vmatprep.subr.bf16.mxu0 %v1712_v1 }
  0x31   :  { %1440 = vmatpush3.bf16.msra.mxu1 %v1814_v26  ;;  %1461 = vmatpush3.bf16.msra.mxu0 %v1808_v23 }
  0x32   :  { %1441 = vmatprep.subr.bf16.mxu1 %v1712_v1  ;;  %1462 = vmatprep.subr.bf16.mxu0 %v1712_v1 }
  0x35   :  { %1443 = vmatpush3.bf16.msra.mxu1 %v1820_v29  ;;  %1464 = vmatpush3.bf16.msra.mxu0 %v1814_v26 }
  0x36   :  { %1468 = vmatprep.subr.bf16.mxu1 %v1712_v1  ;;  %1465 = vmatprep.subr.bf16.mxu0 %v1712_v1 }
  0x38   :  { %1173 = vmatmul.mubr.f32.vlgmr.msra.gmra.mrb[0].mxu1 %v1714_v2 }
  0x39   :  { %1470 = vmatpush3.bf16.msra.mxu1 %v1771_v6  ;;  %1242 = vmatprep.mubr.msk.f32.mxu1 %vm1713_vm0, %v1714_v2 }
  0x3a   :  { %1471 = vmatprep.subr.bf16.mxu1 %v1712_v1  ;;  %1467 = vmatpush3.bf16.msra.mxu0 %v1820_v29 }
  0x3b   :  { %1492 = vmatprep.subr.bf16.mxu0 %v1712_v1 }
  0x3d   :  { %1473 = vmatpush3.bf16.msra.mxu1 %v1774_v8 }
  0x3e   :  { %1474 = vmatprep.subr.bf16.mxu1 %v1712_v1 }
  0x41   :  { %1476 = vmatpush3.bf16.msra.mxu1 %v1788_v14 }
  0x42   :  { %1477 = vmatprep.subr.bf16.mxu1 %v1712_v1 }
  0x45   :  { %1479 = vmatpush3.bf16.msra.mxu1 %v1796_v17 }
  0x46   :  { %1480 = vmatprep.subr.bf16.mxu1 %v1712_v1 }
  0x49   :  { %1482 = vmatpush3.bf16.msra.mxu1 %v1802_v20 }
  0x4a   :  { %1483 = vmatprep.subr.bf16.mxu1 %v1712_v1 }
  0x4d   :  { %1485 = vmatpush3.bf16.msra.mxu1 %v1808_v23 }
  0x4e   :  { %1486 = vmatprep.subr.bf16.mxu1 %v1712_v1 }
  0x51   :  { %1488 = vmatpush3.bf16.msra.mxu1 %v1814_v26 }
  0x52   :  { %1489 = vmatprep.subr.bf16.mxu1 %v1712_v1 }
  0x55   :  { %1491 = vmatpush3.bf16.msra.mxu1 %v1820_v29 }
  0x56   :  { %1516 = vmatprep.subr.bf16.mxu1 %v1712_v1 }
  0xef   :  { %v1850_v30 = vpop.f32.mrb[0].mxu0 }
  0xf0   :  { %v150_v31 = vpop.f32.mrb[1].mxu0  ;;  %v156_v0 = vadd.f32 %v1850_v30, %v1855_v32 }
  0xf1   :  { %v151_v33 = vadd.f32 %v1855_v32, %v150_v31 }
  0xf3   :  { %v1910_v58 = vpop.f32.mrb[2].mxu0 }
  0xf4   :  { %v160_v59 = vpop.f32.mrb[3].mxu0  ;;  %v166_v45 = vadd.f32 %v1910_v58, %v1855_v32 }
  0xf5   :  { %v161_v25 = vadd.f32 %v1855_v32, %v160_v59 }
  0xf7   :  { %v1912_v60 = vpop.f32.mrb[4].mxu0 }
  0xf8   :  { %v1914_v61 = vpop.f32.mrb[5].mxu0 }
  0xfb   :  { %v1916_v62 = vpop.f32.mrb[6].mxu0 }
  0xfc   :  { %v1918_v63 = vpop.f32.mrb[7].mxu0 }
 0x10b   :  { %v274_v34 = vpop.f32.mrb[0].mxu1 }
 0x10c   :  { %v278_v35 = vadd.f32 %v274_v34, %v151_v33  ;;  %v1174_v36 = vpop.f32.mrb[1].mxu1 }
 0x10e   :  { %v964_v37 = vmul.f32 -1.442695, %v278_v35 }
 0x110   :  { %1621 = vpow2.f32 %v964_v37 }
 0x11a   :  { %v1622_v38 = vpop.eup %1621 }
 0x11b   :  { %v282_v39 = vadd.f32 1.0, %v1622_v38 }
 0x11d   :  { %1623 = vrcp.f32 %v282_v39 }
 0x11e   :  { %1625 = vtanh.f32 %v278_v35 }
 0x127   :  { %v1624_v44 = vpop.eup %1623 }
 0x128   :  { %290 = vrot.lane.b32.xlu1 %v1624_v44, %s1715_s25  ;;  %286 = vrot.lane.b32.xlu0 %v1624_v44, %s1716_s26  ;;  %v1626_v47 = vpop.eup %1625 }
 0x12c   :  { %288 = vrot.lane.b32.xlu0 %v1626_v47, %s1717_s7 }
 0x19a   :  { %v287_v48 = vpop.permute.xlu0 %286  ;;  %v291_v56 = vpop.permute.xlu1 %290 }
 0x19b   :  { %v292_v50 = vmul.f32 0.0, %v287_v48 }
 0x19e   :  { %v289_v49 = vpop.permute.xlu0 %288 }
 0x19f   :  { %v293_v51 = vmul.f32 %v1624_v44, %v289_v49 }
 0x1a1   :  { %v294_v52 = vadd.f32 %v293_v51, %v292_v50 }
 0x1a3   :  { %1627 = vtanh.f32 %v294_v52 }
 0x1ad   :  { %v1628_v55 = vpop.eup %1627 }
 0x1ae   :  { %v296_v57 = vmul.f32 %v1628_v55, %v291_v56 }
 0x1b0   :  { %1208 = vmatmul.mubr.msk.f32.vlgmr.msra.gmra.mrb[8].mxu0 %vm207_vm3, %v296_v57 }
 0x1b1   :  { %1494 = vmatpush3.bf16.msra.mxu0 %v1771_v6  ;;  %1277 = vmatprep.mubr.msk.f32.mxu0 %vm1713_vm0, %v1714_v2 }
 0x1b2   :  { %1495 = vmatprep.subr.bf16.mxu0 %v1712_v1 }
 0x1b5   :  { %1497 = vmatpush3.bf16.msra.mxu0 %v1774_v8 }
 0x1b6   :  { %1498 = vmatprep.subr.bf16.mxu0 %v1712_v1 }
 0x1b9   :  { %1500 = vmatpush3.bf16.msra.mxu0 %v1788_v14 }
 0x1ba   :  { %1501 = vmatprep.subr.bf16.mxu0 %v1712_v1 }
 0x1bd   :  { %1503 = vmatpush3.bf16.msra.mxu0 %v1796_v17 }
 0x1be   :  { %1504 = vmatprep.subr.bf16.mxu0 %v1712_v1 }
 0x1c1   :  { %1506 = vmatpush3.bf16.msra.mxu0 %v1802_v20 }
 0x1c2   :  { %1507 = vmatprep.subr.bf16.mxu0 %v1712_v1 }
 0x1c5   :  { %1509 = vmatpush3.bf16.msra.mxu0 %v1808_v23 }
 0x1c6   :  { %1510 = vmatprep.subr.bf16.mxu0 %v1712_v1 }
 0x1c9   :  { %1512 = vmatpush3.bf16.msra.mxu0 %v1814_v26 }
 0x1ca   :  { %1513 = vmatprep.subr.bf16.mxu0 %v1712_v1 }
 0x1cd   :  { %1515 = vmatpush3.bf16.msra.mxu0 %v1820_v29 }
 0x1ce   :  { %1540 = vmatprep.subr.bf16.mxu0 %v1712_v1 }
 0x283   :  { %v364_v3 = vpop.f32.mrb[8].mxu0 }
 0x284   :  { %v368_v4 = vadd.f32 %v364_v3, %v156_v0  ;;  %v1209_v5 = vpop.f32.mrb[9].mxu0 }
 0x285   :  { %v171_v5 = vadd.f32 %v1855_v32, %v1914_v61 }
 0x286   :  { %v966_v7 = vmul.f32 -1.442695, %v368_v4  ;;  %1629 = vtanh.f32 %v368_v4 }
 0x288   :  { %1631 = vpow2.f32 %v966_v7 }
 0x290   :  { %v1630_v9 = vpop.eup %1629 }
 0x291   :  { %378 = vrot.lane.b32.xlu0 %v1630_v9, %s1717_s7 }
 0x292   :  { %v1632_v10 = vpop.eup %1631 }
 0x293   :  { %v372_v11 = vadd.f32 1.0, %v1632_v10 }
 0x295   :  { %1633 = vrcp.f32 %v372_v11 }
 0x29f   :  { %v1634_v12 = vpop.eup %1633 }
 0x2a0   :  { %376 = vrot.lane.b32.xlu1 %v1634_v12, %s1716_s26 }
 0x2a4   :  { %380 = vrot.lane.b32.xlu1 %v1634_v12, %s1715_s25 }
 0x303   :  { %v379_v13 = vpop.permute.xlu0 %378 }
 0x304   :  { %v383_v16 = vmul.f32 %v1634_v12, %v379_v13 }
 0x312   :  { %v377_v15 = vpop.permute.xlu1 %376 }
 0x313   :  { %v382_v18 = vmul.f32 %v377_v15, %v294_v52 }
 0x315   :  { %v384_v19 = vadd.f32 %v383_v16, %v382_v18 }
 0x316   :  { %v381_v22 = vpop.permute.xlu1 %380 }
 0x317   :  { %1635 = vtanh.f32 %v384_v19 }
 0x321   :  { %v1636_v21 = vpop.eup %1635 }
 0x322   :  { %v386_v24 = vmul.f32 %v1636_v21, %v381_v22 }
 0x324   :  { %1243 = vmatmul.mubr.msk.f32.vlgmr.msra.gmra.mrb[2].mxu1 %vm207_vm3, %v386_v24 }
 0x325   :  { %1518 = vmatpush3.bf16.msra.mxu1 %v1771_v6  ;;  %1312 = vmatprep.mubr.msk.f32.mxu1 %vm1713_vm0, %v1714_v2 }
 0x326   :  { %1519 = vmatprep.subr.bf16.mxu1 %v1712_v1 }
 0x329   :  { %1521 = vmatpush3.bf16.msra.mxu1 %v1774_v8 }
 0x32a   :  { %1522 = vmatprep.subr.bf16.mxu1 %v1712_v1 }
 0x32d   :  { %1524 = vmatpush3.bf16.msra.mxu1 %v1788_v14 }
 0x32e   :  { %1525 = vmatprep.subr.bf16.mxu1 %v1712_v1 }
 0x331   :  { %1527 = vmatpush3.bf16.msra.mxu1 %v1796_v17 }
 0x332   :  { %1528 = vmatprep.subr.bf16.mxu1 %v1712_v1 }
 0x335   :  { %1530 = vmatpush3.bf16.msra.mxu1 %v1802_v20 }
 0x336   :  { %1531 = vmatprep.subr.bf16.mxu1 %v1712_v1 }
 0x339   :  { %1533 = vmatpush3.bf16.msra.mxu1 %v1808_v23 }
 0x33a   :  { %1534 = vmatprep.subr.bf16.mxu1 %v1712_v1 }
 0x33d   :  { %1536 = vmatpush3.bf16.msra.mxu1 %v1814_v26 }
 0x33e   :  { %1537 = vmatprep.subr.bf16.mxu1 %v1712_v1 }
 0x341   :  { %1539 = vmatpush3.bf16.msra.mxu1 %v1820_v29 }
 0x342   :  { %1564 = vmatprep.subr.bf16.mxu1 %v1712_v1 }
 0x3f7   :  { %v454_v27 = vpop.f32.mrb[2].mxu1 }
 0x3f8   :  { %v458_v28 = vadd.f32 %v454_v27, %v161_v25  ;;  %v1244_v30 = vpop.f32.mrb[3].mxu1 }
 0x3fa   :  { %v968_v31 = vmul.f32 -1.442695, %v458_v28  ;;  %1637 = vtanh.f32 %v458_v28 }
 0x3fc   :  { %1639 = vpow2.f32 %v968_v31 }
 0x404   :  { %v1638_v33 = vpop.eup %1637 }
 0x405   :  { %468 = vrot.lane.b32.xlu1 %v1638_v33, %s1717_s7 }
 0x406   :  { %v1640_v34 = vpop.eup %1639 }
 0x407   :  { %v462_v35 = vadd.f32 1.0, %v1640_v34 }
 0x409   :  { %1641 = vrcp.f32 %v462_v35 }
 0x413   :  { %v1642_v36 = vpop.eup %1641 }
 0x414   :  { %466 = vrot.lane.b32.xlu0 %v1642_v36, %s1716_s26 }
 0x418   :  { %470 = vrot.lane.b32.xlu0 %v1642_v36, %s1715_s25 }
 0x477   :  { %v469_v37 = vpop.permute.xlu1 %468 }
 0x478   :  { %v473_v39 = vmul.f32 %v1642_v36, %v469_v37  ;;  %v181_v36 = vadd.f32 %v1855_v32, %v1918_v63 }
 0x486   :  { %v467_v38 = vpop.permute.xlu0 %466 }
 0x487   :  { %v472_v40 = vmul.f32 %v467_v38, %v384_v19 }
 0x489   :  { %v474_v41 = vadd.f32 %v473_v39, %v472_v40 }
 0x48a   :  { %v471_v43 = vpop.permute.xlu0 %470 }
 0x48b   :  { %1643 = vtanh.f32 %v474_v41 }
 0x495   :  { %v1644_v42 = vpop.eup %1643 }
 0x496   :  { %v476_v44 = vmul.f32 %v1644_v42, %v471_v43 }
 0x498   :  { %1278 = vmatmul.mubr.msk.f32.vlgmr.msra.gmra.mrb[10].mxu0 %vm207_vm3, %v476_v44 }
 0x499   :  { %1542 = vmatpush3.bf16.msra.mxu0 %v1771_v6  ;;  %1347 = vmatprep.mubr.msk.f32.mxu0 %vm1713_vm0, %v1714_v2 }
 0x49a   :  { %1543 = vmatprep.subr.bf16.mxu0 %v1712_v1 }
 0x49d   :  { %1545 = vmatpush3.bf16.msra.mxu0 %v1774_v8 }
 0x49e   :  { %1546 = vmatprep.subr.bf16.mxu0 %v1712_v1 }
 0x4a1   :  { %1548 = vmatpush3.bf16.msra.mxu0 %v1788_v14 }
 0x4a2   :  { %1549 = vmatprep.subr.bf16.mxu0 %v1712_v1 }
 0x4a5   :  { %1551 = vmatpush3.bf16.msra.mxu0 %v1796_v17 }
 0x4a6   :  { %1552 = vmatprep.subr.bf16.mxu0 %v1712_v1 }
 0x4a9   :  { %1554 = vmatpush3.bf16.msra.mxu0 %v1802_v20 }
 0x4aa   :  { %1555 = vmatprep.subr.bf16.mxu0 %v1712_v1 }
 0x4ad   :  { %1557 = vmatpush3.bf16.msra.mxu0 %v1808_v23 }
 0x4ae   :  { %1558 = vmatprep.subr.bf16.mxu0 %v1712_v1 }
 0x4b1   :  { %1560 = vmatpush3.bf16.msra.mxu0 %v1814_v26 }
 0x4b2   :  { %1561 = vmatprep.subr.bf16.mxu0 %v1712_v1 }
 0x4b5   :  { %1563 = vmatpush3.bf16.msra.mxu0 %v1820_v29 }
 0x4b6   :  { %1588 = vmatprep.subr.bf16.mxu0 %v1712_v1 }
 0x56b   :  { %v544_v46 = vpop.f32.mrb[10].mxu0 }
 0x56c   :  { %v548_v47 = vadd.f32 %v544_v46, %v166_v45  ;;  %v1279_v48 = vpop.f32.mrb[11].mxu0 }
 0x56e   :  { %v970_v49 = vmul.f32 -1.442695, %v548_v47  ;;  %1645 = vtanh.f32 %v548_v47 }
 0x570   :  { %1647 = vpow2.f32 %v970_v49 }
 0x578   :  { %v1646_v50 = vpop.eup %1645 }
 0x579   :  { %558 = vrot.lane.b32.xlu0 %v1646_v50, %s1717_s7 }
 0x57a   :  { %v1648_v51 = vpop.eup %1647 }
 0x57b   :  { %v552_v52 = vadd.f32 1.0, %v1648_v51 }
 0x57d   :  { %1649 = vrcp.f32 %v552_v52  ;;  %v186_v52 = vadd.f32 %v1916_v62, %v1855_v32 }
 0x587   :  { %v1650_v53 = vpop.eup %1649 }
 0x588   :  { %556 = vrot.lane.b32.xlu1 %v1650_v53, %s1716_s26 }
 0x58c   :  { %560 = vrot.lane.b32.xlu1 %v1650_v53, %s1715_s25 }
 0x5eb   :  { %v559_v55 = vpop.permute.xlu0 %558 }
 0x5ec   :  { %v563_v57 = vmul.f32 %v1650_v53, %v559_v55 }
 0x5fa   :  { %v557_v56 = vpop.permute.xlu1 %556 }
 0x5fb   :  { %v562_v58 = vmul.f32 %v557_v56, %v474_v41 }
 0x5fd   :  { %v564_v59 = vadd.f32 %v563_v57, %v562_v58 }
 0x5fe   :  { %v561_v3 = vpop.permute.xlu1 %560 }
 0x5ff   :  { %1651 = vtanh.f32 %v564_v59 }
 0x609   :  { %v1652_v0 = vpop.eup %1651 }
 0x60a   :  { %v566_v4 = vmul.f32 %v1652_v0, %v561_v3 }
 0x60c   :  { %1313 = vmatmul.mubr.msk.f32.vlgmr.msra.gmra.mrb[4].mxu1 %vm207_vm3, %v566_v4 }
 0x60d   :  { %1566 = vmatpush3.bf16.msra.mxu1 %v1771_v6  ;;  %1382 = vmatprep.mubr.msk.f32.mxu1 %vm1713_vm0, %v1714_v2 }
 0x60e   :  { %1567 = vmatprep.subr.bf16.mxu1 %v1712_v1 }
 0x611   :  { %1569 = vmatpush3.bf16.msra.mxu1 %v1774_v8 }
 0x612   :  { %1570 = vmatprep.subr.bf16.mxu1 %v1712_v1 }
 0x615   :  { %1572 = vmatpush3.bf16.msra.mxu1 %v1788_v14 }
 0x616   :  { %1573 = vmatprep.subr.bf16.mxu1 %v1712_v1 }
 0x619   :  { %1575 = vmatpush3.bf16.msra.mxu1 %v1796_v17 }
 0x61a   :  { %1576 = vmatprep.subr.bf16.mxu1 %v1712_v1 }
 0x61d   :  { %1578 = vmatpush3.bf16.msra.mxu1 %v1802_v20 }
 0x61e   :  { %1579 = vmatprep.subr.bf16.mxu1 %v1712_v1 }
 0x621   :  { %1581 = vmatpush3.bf16.msra.mxu1 %v1808_v23 }
 0x622   :  { %1582 = vmatprep.subr.bf16.mxu1 %v1712_v1 }
 0x625   :  { %1584 = vmatpush3.bf16.msra.mxu1 %v1814_v26 }
 0x626   :  { %1585 = vmatprep.subr.bf16.mxu1 %v1712_v1 }
 0x629   :  { %1587 = vmatpush3.bf16.msra.mxu1 %v1820_v29 }
 0x6df   :  { %v634_v7 = vpop.f32.mrb[4].mxu1 }
 0x6e0   :  { %v638_v9 = vadd.f32 %v634_v7, %v171_v5  ;;  %v1314_v10 = vpop.f32.mrb[5].mxu1 }
 0x6e2   :  { %v972_v11 = vmul.f32 -1.442695, %v638_v9  ;;  %1653 = vtanh.f32 %v638_v9 }
 0x6e4   :  { %1655 = vpow2.f32 %v972_v11 }
 0x6ec   :  { %v1654_v12 = vpop.eup %1653 }
 0x6ed   :  { %648 = vrot.lane.b32.xlu1 %v1654_v12, %s1717_s7 }
 0x6ee   :  { %v1656_v13 = vpop.eup %1655 }
 0x6ef   :  { %v642_v15 = vadd.f32 1.0, %v1656_v13  ;;  %v979_v13 = vld [vmem:[%s2048_s4] ss:$0 sm:$0xff] }
 0x6f1   :  { %1657 = vrcp.f32 %v642_v15 }
 0x6fb   :  { %v1658_v16 = vpop.eup %1657 }
 0x6fc   :  { %646 = vrot.lane.b32.xlu0 %v1658_v16, %s1716_s26 }
 0x700   :  { %650 = vrot.lane.b32.xlu0 %v1658_v16, %s1715_s25 }
 0x75f   :  { %v649_v18 = vpop.permute.xlu1 %648 }
 0x760   :  { %v653_v61 = vmul.f32 %v1658_v16, %v649_v18  ;;  %v980_v18 = vld [vmem:[#allocation2] ss:$0 sm:$0xff] }
 0x76e   :  { %v647_v19 = vpop.permute.xlu0 %646 }
 0x76f   :  { %v652_v21 = vmul.f32 %v647_v19, %v564_v59 }
 0x771   :  { %v654_v22 = vadd.f32 %v653_v61, %v652_v21 }
 0x772   :  { %v651_v25 = vpop.permute.xlu0 %650 }
 0x773   :  { %1659 = vtanh.f32 %v654_v22 }
 0x77d   :  { %v1660_v24 = vpop.eup %1659 }
 0x77e   :  { %v656_v27 = vmul.f32 %v1660_v24, %v651_v25 }
 0x780   :  { %1348 = vmatmul.mubr.msk.f32.vlgmr.msra.gmra.mrb[12].mxu0 %vm207_vm3, %v656_v27 }
 0x781   :  { %1590 = vmatpush3.bf16.msra.mxu0 %v1771_v6  ;;  %1417 = vmatprep.mubr.msk.f32.mxu0 %vm1713_vm0, %v1714_v2  ;;  %v176_v2 = vadd.f32 %v1912_v60, %v1855_v32 }
 0x782   :  { %1591 = vmatprep.subr.bf16.mxu0 %v1712_v1 }
 0x785   :  { %1593 = vmatpush3.bf16.msra.mxu0 %v1774_v8 }
 0x786   :  { %1594 = vmatprep.subr.bf16.mxu0 %v1712_v1 }
 0x789   :  { %1596 = vmatpush3.bf16.msra.mxu0 %v1788_v14 }
 0x78a   :  { %1597 = vmatprep.subr.bf16.mxu0 %v1712_v1 }
 0x78d   :  { %1599 = vmatpush3.bf16.msra.mxu0 %v1796_v17 }
 0x78e   :  { %1600 = vmatprep.subr.bf16.mxu0 %v1712_v1 }
 0x791   :  { %1602 = vmatpush3.bf16.msra.mxu0 %v1802_v20 }
 0x792   :  { %1603 = vmatprep.subr.bf16.mxu0 %v1712_v1 }
 0x795   :  { %1605 = vmatpush3.bf16.msra.mxu0 %v1808_v23 }
 0x796   :  { %1606 = vmatprep.subr.bf16.mxu0 %v1712_v1 }
 0x799   :  { %1608 = vmatpush3.bf16.msra.mxu0 %v1814_v26 }
 0x79a   :  { %1609 = vmatprep.subr.bf16.mxu0 %v1712_v1 }
 0x79d   :  { %1611 = vmatpush3.bf16.msra.mxu0 %v1820_v29 }
 0x853   :  { %v724_v6 = vpop.f32.mrb[12].mxu0 }
 0x854   :  { %v728_v8 = vadd.f32 %v724_v6, %v176_v2  ;;  %v1349_v14 = vpop.f32.mrb[13].mxu0 }
 0x856   :  { %v974_v17 = vmul.f32 -1.442695, %v728_v8  ;;  %1661 = vtanh.f32 %v728_v8 }
 0x858   :  { %1663 = vpow2.f32 %v974_v17 }
 0x860   :  { %v1662_v20 = vpop.eup %1661 }
 0x861   :  { %738 = vrot.lane.b32.xlu0 %v1662_v20, %s1717_s7 }
 0x862   :  { %v1664_v23 = vpop.eup %1663 }
 0x863   :  { %v732_v28 = vadd.f32 1.0, %v1664_v23 }
 0x865   :  { %1665 = vrcp.f32 %v732_v28 }
 0x86f   :  { %v1666_v26 = vpop.eup %1665 }
 0x870   :  { %736 = vrot.lane.b32.xlu1 %v1666_v26, %s1716_s26 }
 0x874   :  { %740 = vrot.lane.b32.xlu1 %v1666_v26, %s1715_s25 }
 0x8d3   :  { %v739_v1 = vpop.permute.xlu0 %738 }
 0x8d4   :  { %v743_v60 = vmul.f32 %v1666_v26, %v739_v1 }
 0x8e2   :  { %v737_v29 = vpop.permute.xlu1 %736 }
 0x8e3   :  { %v742_v30 = vmul.f32 %v737_v29, %v654_v22 }
 0x8e5   :  { %v744_v31 = vadd.f32 %v743_v60, %v742_v30 }
 0x8e6   :  { %v741_v34 = vpop.permute.xlu1 %740 }
 0x8e7   :  { %1667 = vtanh.f32 %v744_v31 }
 0x8f1   :  { %v1668_v33 = vpop.eup %1667 }
 0x8f2   :  { %v746_v35 = vmul.f32 %v1668_v33, %v741_v34 }
 0x8f4   :  { %1383 = vmatmul.mubr.msk.f32.vlgmr.msra.gmra.mrb[6].mxu1 %vm207_vm3, %v746_v35 }
 0x9c7   :  { %v814_v37 = vpop.f32.mrb[6].mxu1 }
 0x9c8   :  { %v818_v38 = vadd.f32 %v814_v37, %v181_v36  ;;  %v1384_v39 = vpop.f32.mrb[7].mxu1 }
 0x9ca   :  { %v976_v40 = vmul.f32 -1.442695, %v818_v38  ;;  %1669 = vtanh.f32 %v818_v38 }
 0x9cc   :  { %1671 = vpow2.f32 %v976_v40 }
 0x9d4   :  { %v1670_v41 = vpop.eup %1669 }
 0x9d5   :  { %828 = vrot.lane.b32.xlu1 %v1670_v41, %s1717_s7 }
 0x9d6   :  { %v1672_v42 = vpop.eup %1671 }
 0x9d7   :  { %v822_v43 = vadd.f32 1.0, %v1672_v42 }
 0x9d9   :  { %1673 = vrcp.f32 %v822_v43 }
 0x9e3   :  { %v1674_v44 = vpop.eup %1673 }
 0x9e4   :  { %826 = vrot.lane.b32.xlu0 %v1674_v44, %s1716_s26 }
 0x9e8   :  { %830 = vrot.lane.b32.xlu0 %v1674_v44, %s1715_s25 }
 0xa47   :  { %v829_v45 = vpop.permute.xlu1 %828 }
 0xa48   :  { %v833_v63 = vmul.f32 %v1674_v44, %v829_v45 }
 0xa56   :  { %v827_v46 = vpop.permute.xlu0 %826 }
 0xa57   :  { %v832_v47 = vmul.f32 %v827_v46, %v744_v31 }
 0xa59   :  { %v834_v48 = vadd.f32 %v833_v63, %v832_v47 }
 0xa5a   :  { %v831_v50 = vpop.permute.xlu0 %830 }
 0xa5b   :  { %1675 = vtanh.f32 %v834_v48 }
 0xa65   :  { %v1676_v49 = vpop.eup %1675 }
 0xa66   :  { %v836_v51 = vmul.f32 %v1676_v49, %v831_v50 }
 0xa68   :  { %1418 = vmatmul.mubr.msk.f32.vlgmr.msra.gmra.mrb[14].mxu0 %vm207_vm3, %v836_v51 }
 0xb3b   :  { %v904_v53 = vpop.f32.mrb[14].mxu0 }
 0xb3c   :  { %v908_v55 = vadd.f32 %v904_v53, %v186_v52  ;;  %v1419_v56 = vpop.f32.mrb[15].mxu0 }
 0xb3e   :  { %v978_v57 = vmul.f32 -1.442695, %v908_v55  ;;  %1677 = vtanh.f32 %v908_v55 }
 0xb40   :  { %1679 = vpow2.f32 %v978_v57 }
 0xb48   :  { %v1678_v58 = vpop.eup %1677 }
 0xb49   :  { %918 = vrot.lane.b32.xlu0 %v1678_v58, %s1717_s7 }
 0xb4a   :  { %v1680_v59 = vpop.eup %1679 }
 0xb4b   :  { %v912_v0 = vadd.f32 1.0, %v1680_v59 }
 0xb4d   :  { %1681 = vrcp.f32 %v912_v0 }
 0xb57   :  { %v1682_v3 = vpop.eup %1681 }
 0xb58   :  { %916 = vrot.lane.b32.xlu1 %v1682_v3, %s1716_s26 }
 0xb5c   :  { %920 = vrot.lane.b32.xlu1 %v1682_v3, %s1715_s25 }
 0xbbb   :  { %v919_v4 = vpop.permute.xlu0 %918 }
 0xbbc   :  { %v923_v32 = vmul.f32 %v1682_v3, %v919_v4 }
 0xbca   :  { %v917_v5 = vpop.permute.xlu1 %916 }
 0xbcb   :  { %v922_v62 = vmul.f32 %v917_v5, %v834_v48 }
 0xbcd   :  { %v924_v7 = vadd.f32 %v923_v32, %v922_v62 }
 0xbce   :  { %v921_v10 = vpop.permute.xlu1 %920 }
 0xbcf   :  { %1683 = vtanh.f32 %v924_v7 }
 0xbd9   :  { %v1684_v9 = vpop.eup %1683 }
 0xbda   :  { %v926_v11 = vmul.f32 %v1684_v9, %v921_v10 }
 0xbdc   :  { %v927_v12 = vsel %vm207_vm3, %v926_v11, 0.0 }
 0xbdd   :  { %v928_v15 = vmax.f32 %v927_v12, 0.0 }
 0xbdf   :  { %v936_v16 = vmul.f32 %v979_v13, %v928_v15 }
 0xbe1   :  { %937 = vadd.xlane.f32.xlu0 %v936_v16 }
 0xc6e   :  { %v938_v19 = vpop.xlane.xlu0 %937 }
 0xc6f   :  { %v946_v61 = vadd.f32 %v980_v18, %v938_v19 }
 0xc71   :  { %948 = vst.msk [vmem:[%s2050_s6] sm:$0xff] %vm947_vm4, %v946_v61 }
 0xc72   :  { %953 = vsyncpa [#allocation4], 1 }

</bundles_post_ra>
